<compile_context>
chip_gen: v6e
topology: v6e:2x2x1
jax: 0.10.0
libtpu: 0.0.40
codegen_flags: <defaults>
</compile_context>

<pallas_src>
import math

import jax
import jax.numpy as jnp
import numpy as np
from jax.experimental import pallas as pl
from jax.experimental.pallas import tpu as pltpu

N_HEADS = 8
EMBED_DIM = 128
HEAD_DEPTH = EMBED_DIM // N_HEADS          # 16
SCALE = math.sqrt(HEAD_DEPTH)              # sqrt(head_depth), as in DotProductAttention
NEG_INF = 1.0e10                           # module's self.inf

# bf16 MXU inputs (native on v5e/v6e/v7x).  Accumulation / softmax / normalisation stay
# f32 via preferred_element_type, so only input rounding error remains (~1e-2 level).
MATMUL_DTYPE = jnp.bfloat16
ROWS_PER_STEP = 512                        # target Bt*N rows per grid step


def _mha_kernel(x_ref, bias_ref, wqkv_ref, wout_ref, o_ref):
    """One grid step = `Bt` batch elements.

    x_ref    : (Bt, N, E)    shared Q/K/V input (encoder self-attention), f32
    bias_ref : (Bt, 1, N)    additive key mask (0 keep / -1e10 masked), f32
    wqkv_ref : (E, 3E)       [Wq/sqrt(hd) | Wk | Wv] columns, bf16
    wout_ref : (E, E)        Wout, bf16
    o_ref    : (Bt, N, E)    f32
    """
    Bt, N, E = x_ref.shape
    H = N_HEADS
    hd = E // H
    R = Bt * N                                              # MXU rows per step

    # ---- fused dense QKV projection: one (R,E) @ (E,3E) matmul, full 128-deep K ----
    x2d = x_ref[...].reshape(R, E).astype(MATMUL_DTYPE)     # leading-dim merge: free
    qkv = jnp.dot(x2d, wqkv_ref[...],
                  preferred_element_type=jnp.float32)       # (R, 3E) f32

    # ---- split heads: static lane slices + leading-dim stack (index = h*Bt + b) ----
    def split_heads(col0):
        parts = [qkv[:, col0 + h * hd: col0 + (h + 1) * hd].reshape(Bt, N, hd)
                 for h in range(H)]
        return jnp.concatenate(parts, axis=0)               # (H*Bt, N, hd)

    q = split_heads(0)          # f32 (scale already folded into Wq)
    k = split_heads(E)          # f32
    v = split_heads(2 * E)      # f32

    # ---- attention, batched over (head, batch) in one merged leading dim ----
    logits = jnp.einsum("bqd,bkd->bqk", q, k,
                        preferred_element_type=jnp.float32)  # (H*Bt, N, N) f32

    # additive key-mask bias via broadcast-add (no tile / materialised head copies)
    logits = (logits.reshape(H, Bt, N, N) + bias_ref[...][None]).reshape(H * Bt, N, N)

    m = jnp.max(logits, axis=-1, keepdims=True)
    p = jnp.exp(logits - m)
    denom = jnp.sum(p, axis=-1, keepdims=True)               # f32

    ctx = jnp.einsum("bqk,bkd->bqd",
                     p.astype(MATMUL_DTYPE), v.astype(MATMUL_DTYPE),
                     preferred_element_type=jnp.float32)     # (H*Bt, N, hd) f32
    ctx = ctx / denom                                        # exact f32 normalisation

    # ---- combine_heads (lane concat) + Wout as ONE (R,E)@(E,E) matmul ----
    ctx4 = ctx.reshape(H, Bt, N, hd)                         # leading split: free
    ctx_cat = jnp.concatenate([ctx4[h] for h in range(H)], axis=-1)  # (Bt, N, E)
    y = jnp.dot(ctx_cat.reshape(R, E).astype(MATMUL_DTYPE), wout_ref[...],
                preferred_element_type=jnp.float32)          # (R, E) f32

    o_ref[...] = y.reshape(Bt, N, E).astype(o_ref.dtype)


def _choose_block_b(B, N):
    """Aim for ~ROWS_PER_STEP rows per grid step; keep >=2 steps when B > 1 (v7x)."""
    bb = max(1, ROWS_PER_STEP // N)
    if B > 1:
        bb = min(bb, (B + 1) // 2)       # guarantee >=2 grid steps -> both v7x TCs used
    return max(1, min(bb, B))


@jax.jit
def mha_pallas(x, mask, Wq, Wk, Wv, Wo):
    """Encoder-style MultiHeadAttention forward (need_W=True, x = [x, x, x]).

    x   : (B, N, E) f32;  mask: (B, N, 1) bool (True = masked key) or None
    W*  : (E, E) f32 stored as (in_features, out_features), i.e. y = x @ W.
    """
    B, N, E = x.shape

    # --- wrapper-side weight prep (once, under jit): scale folded into Wq, QKV fused ---
    wqkv = jnp.concatenate([Wq / SCALE, Wk, Wv], axis=1).astype(MATMUL_DTYPE)  # (E, 3E)
    wout = Wo.astype(MATMUL_DTYPE)                                             # (E, E)

    # additive key-mask bias (replaces per-head compare+select in the kernel)
    if mask is None:
        bias = jnp.zeros((B, 1, N), dtype=jnp.float32)
    else:
        bias = jnp.where(mask[:, :, 0], -NEG_INF, 0.0).astype(jnp.float32)[:, None, :]

    # batch folding with a cdiv grid (wrapper-side zero padding; padded rows are benign
    # and sliced off afterwards) instead of requiring block_b | B.
    block_b = _choose_block_b(B, N)
    n_steps = -(-B // block_b)
    B_pad = n_steps * block_b
    if B_pad != B:
        x = jnp.pad(x, ((0, B_pad - B), (0, 0), (0, 0)))
        bias = jnp.pad(bias, ((0, B_pad - B), (0, 0), (0, 0)))

    grid_spec = pltpu.PrefetchScalarGridSpec(
        num_scalar_prefetch=0,
        grid=(n_steps,),
        in_specs=[
            pl.BlockSpec((block_b, N, E), lambda b: (b, 0, 0)),   # x
            pl.BlockSpec((block_b, 1, N), lambda b: (b, 0, 0)),   # mask bias
            pl.BlockSpec((E, 3 * E), lambda b: (0, 0)),           # fused Wqkv (invariant)
            pl.BlockSpec((E, E), lambda b: (0, 0)),               # Wout (invariant)
        ],
        out_specs=pl.BlockSpec((block_b, N, E), lambda b: (b, 0, 0)),
    )

    out = pl.pallas_call(
        _mha_kernel,
        out_shape=jax.ShapeDtypeStruct((B_pad, N, E), jnp.float32),
        grid_spec=grid_spec,
        compiler_params=pltpu.CompilerParams(
            dimension_semantics=("parallel",),       # megacore-shard the batch grid
            vmem_limit_bytes=32 * 1024 * 1024,       # safe w.r.t. v7x's 64 MiB physical VMEM
        ),
    )(x, bias, wqkv, wout)
    return out[:B]


def mha_reference(x, mask, Wq, Wk, Wv, Wo):
    """Pure-JAX f32 reference mirroring the PyTorch forward (need_W=True, self-attn)."""
    B, N, E = x.shape
    Qp, Kp, Vp = x @ Wq, x @ Wk, x @ Wv

    def split(T):
        return T.reshape(B, N, N_HEADS, HEAD_DEPTH).transpose(0, 2, 1, 3)

    Qh, Kh, Vh = split(Qp), split(Kp), split(Vp)
    logits = jnp.einsum("bhqd,bhkd->bhqk", Qh, Kh) / SCALE
    if mask is not None:
        mk = mask[:, None, None, :, 0]                      # (B,1,1,N)
        logits = jnp.where(mk, -NEG_INF, logits)
    probs = jax.nn.softmax(logits, axis=-1)
    out = jnp.einsum("bhqk,bhkd->bhqd", probs, Vh)
    out = out.transpose(0, 2, 1, 3).reshape(B, N, E)
    return out @ Wo


if __name__ == "__main__":
    B, N, E = 2, 16, EMBED_DIM

    key = jax.random.PRNGKey(0)
    kx, kq, kk, kv, ko = jax.random.split(key, 5)

    # encoder-style call: x = [x, x, x]
    x = jax.random.normal(kx, (B, N, E), dtype=jnp.float32)

    # deterministic weight init matching init_parameters():
    #   Wq/Wk/Wv ~ U(-1/sqrt(head_depth), ...); Wout ~ U(-1/sqrt(embed_dim), ...)
    s_qkv = 1.0 / math.sqrt(HEAD_DEPTH)
    s_out = 1.0 / math.sqrt(EMBED_DIM)
    Wq = jax.random.uniform(kq, (E, E), minval=-s_qkv, maxval=s_qkv, dtype=jnp.float32)
    Wk = jax.random.uniform(kk, (E, E), minval=-s_qkv, maxval=s_qkv, dtype=jnp.float32)
    Wv = jax.random.uniform(kv, (E, E), minval=-s_qkv, maxval=s_qkv, dtype=jnp.float32)
    Wo = jax.random.uniform(ko, (E, E), minval=-s_out, maxval=s_out, dtype=jnp.float32)

    # mask: (B, N, 1) bool, True = masked key node (keep at least one node unmasked)
    node_ids = jnp.arange(N)
    mask = jnp.stack([node_ids >= 12, node_ids >= 14], axis=0)[:, :, None]

    out = mha_pallas(x, mask, Wq, Wk, Wv, Wo)
    out = jax.block_until_ready(out)

    ref = mha_reference(x, mask, Wq, Wk, Wv, Wo)
    # Softmax/accumulation are exact f32; residual deviation comes only from bf16
    # rounding of the MXU inputs (x, Wqkv, Wout, probs, v), so a bf16-level tolerance
    # is used.  Structural/indexing bugs would show up as O(1) errors.
    np.testing.assert_allclose(np.asarray(out), np.asarray(ref), rtol=5e-2, atol=5e-2)

    print("KERNEL_OK")
</pallas_src>

<mosaic_0001>
module attributes {stable_mosaic.version = 11 : i64} {
  func.func @_mha_kernel(%arg0: i32, %arg1: memref<1x16x128xf32, #tpu.memory_space<vmem>>, %arg2: memref<1x1x16xf32, #tpu.memory_space<vmem>>, %arg3: memref<128x384xbf16, #tpu.memory_space<vmem>>, %arg4: memref<128x128xbf16, #tpu.memory_space<vmem>>, %arg5: memref<1x16x128xf32, #tpu.memory_space<vmem>>) attributes {dimension_semantics = [#tpu.dimension_semantics<parallel>], iteration_bounds = array<i64: 2>, scalar_prefetch = 0 : i64, scratch_operands = 0 : i64, tpu.core_type = #tpu.core_type<tc>, window_params = [{transform_indices = @transform_0, window_bounds = array<i64: 1, 16, 128>}, {transform_indices = @transform_1, window_bounds = array<i64: 1, 1, 16>}, {pipeline_mode = #tpu.pipeline_mode<synchronous>, transform_indices = @transform_2, window_bounds = array<i64: 128, 384>}, {pipeline_mode = #tpu.pipeline_mode<synchronous>, transform_indices = @transform_3, window_bounds = array<i64: 128, 128>}, {transform_indices = @transform_4, window_bounds = array<i64: 1, 16, 128>}]} {
    %c0 = arith.constant 0 : index
    %c0_0 = arith.constant 0 : index
    %c0_1 = arith.constant 0 : index
    %0 = vector.load %arg1[%c0, %c0_0, %c0_1] : memref<1x16x128xf32, #tpu.memory_space<vmem>>, vector<1x16x128xf32>
    %1 = vector.shape_cast %0 : vector<1x16x128xf32> to vector<16x128xf32>
    %2 = arith.truncf %1 : vector<16x128xf32> to vector<16x128xbf16>
    %c0_2 = arith.constant 0 : index
    %c0_3 = arith.constant 0 : index
    %3 = vector.load %arg3[%c0_2, %c0_3] : memref<128x384xbf16, #tpu.memory_space<vmem>>, vector<128x384xbf16>
    %cst = arith.constant dense<0.000000e+00> : vector<16x384xf32>
    %4 = tpu.matmul %2, %3, %cst {dimension_numbers = #tpu.dot_dimension_numbers<[1], [0], [0], [1], [0, 0, 1, 1], [], []>} : vector<16x128xbf16>, vector<128x384xbf16>, vector<16x384xf32> -> vector<16x384xf32>
    %5 = vector.extract_strided_slice %4 {offsets = [0, 0], sizes = [16, 16], strides = [1, 1]} : vector<16x384xf32> to vector<16x16xf32>
    %6 = vector.shape_cast %5 : vector<16x16xf32> to vector<1x16x16xf32>
    %7 = vector.extract_strided_slice %4 {offsets = [0, 16], sizes = [16, 16], strides = [1, 1]} : vector<16x384xf32> to vector<16x16xf32>
    %8 = vector.shape_cast %7 : vector<16x16xf32> to vector<1x16x16xf32>
    %9 = vector.extract_strided_slice %4 {offsets = [0, 32], sizes = [16, 16], strides = [1, 1]} : vector<16x384xf32> to vector<16x16xf32>
    %10 = vector.shape_cast %9 : vector<16x16xf32> to vector<1x16x16xf32>
    %11 = vector.extract_strided_slice %4 {offsets = [0, 48], sizes = [16, 16], strides = [1, 1]} : vector<16x384xf32> to vector<16x16xf32>
    %12 = vector.shape_cast %11 : vector<16x16xf32> to vector<1x16x16xf32>
    %13 = vector.extract_strided_slice %4 {offsets = [0, 64], sizes = [16, 16], strides = [1, 1]} : vector<16x384xf32> to vector<16x16xf32>
    %14 = vector.shape_cast %13 : vector<16x16xf32> to vector<1x16x16xf32>
    %15 = vector.extract_strided_slice %4 {offsets = [0, 80], sizes = [16, 16], strides = [1, 1]} : vector<16x384xf32> to vector<16x16xf32>
    %16 = vector.shape_cast %15 : vector<16x16xf32> to vector<1x16x16xf32>
    %17 = vector.extract_strided_slice %4 {offsets = [0, 96], sizes = [16, 16], strides = [1, 1]} : vector<16x384xf32> to vector<16x16xf32>
    %18 = vector.shape_cast %17 : vector<16x16xf32> to vector<1x16x16xf32>
    %19 = vector.extract_strided_slice %4 {offsets = [0, 112], sizes = [16, 16], strides = [1, 1]} : vector<16x384xf32> to vector<16x16xf32>
    %20 = vector.shape_cast %19 : vector<16x16xf32> to vector<1x16x16xf32>
    %21 = tpu.concatenate %6, %8, %10, %12, %14, %16, %18, %20 in 0 : vector<1x16x16xf32>, vector<1x16x16xf32>, vector<1x16x16xf32>, vector<1x16x16xf32>, vector<1x16x16xf32>, vector<1x16x16xf32>, vector<1x16x16xf32>, vector<1x16x16xf32> -> vector<8x16x16xf32>
    %22 = vector.extract_strided_slice %4 {offsets = [0, 128], sizes = [16, 16], strides = [1, 1]} : vector<16x384xf32> to vector<16x16xf32>
    %23 = vector.shape_cast %22 : vector<16x16xf32> to vector<1x16x16xf32>
    %24 = vector.extract_strided_slice %4 {offsets = [0, 144], sizes = [16, 16], strides = [1, 1]} : vector<16x384xf32> to vector<16x16xf32>
    %25 = vector.shape_cast %24 : vector<16x16xf32> to vector<1x16x16xf32>
    %26 = vector.extract_strided_slice %4 {offsets = [0, 160], sizes = [16, 16], strides = [1, 1]} : vector<16x384xf32> to vector<16x16xf32>
    %27 = vector.shape_cast %26 : vector<16x16xf32> to vector<1x16x16xf32>
    %28 = vector.extract_strided_slice %4 {offsets = [0, 176], sizes = [16, 16], strides = [1, 1]} : vector<16x384xf32> to vector<16x16xf32>
    %29 = vector.shape_cast %28 : vector<16x16xf32> to vector<1x16x16xf32>
    %30 = vector.extract_strided_slice %4 {offsets = [0, 192], sizes = [16, 16], strides = [1, 1]} : vector<16x384xf32> to vector<16x16xf32>
    %31 = vector.shape_cast %30 : vector<16x16xf32> to vector<1x16x16xf32>
    %32 = vector.extract_strided_slice %4 {offsets = [0, 208], sizes = [16, 16], strides = [1, 1]} : vector<16x384xf32> to vector<16x16xf32>
    %33 = vector.shape_cast %32 : vector<16x16xf32> to vector<1x16x16xf32>
    %34 = vector.extract_strided_slice %4 {offsets = [0, 224], sizes = [16, 16], strides = [1, 1]} : vector<16x384xf32> to vector<16x16xf32>
    %35 = vector.shape_cast %34 : vector<16x16xf32> to vector<1x16x16xf32>
    %36 = vector.extract_strided_slice %4 {offsets = [0, 240], sizes = [16, 16], strides = [1, 1]} : vector<16x384xf32> to vector<16x16xf32>
    %37 = vector.shape_cast %36 : vector<16x16xf32> to vector<1x16x16xf32>
    %38 = tpu.concatenate %23, %25, %27, %29, %31, %33, %35, %37 in 0 : vector<1x16x16xf32>, vector<1x16x16xf32>, vector<1x16x16xf32>, vector<1x16x16xf32>, vector<1x16x16xf32>, vector<1x16x16xf32>, vector<1x16x16xf32>, vector<1x16x16xf32> -> vector<8x16x16xf32>
    %39 = vector.extract_strided_slice %4 {offsets = [0, 256], sizes = [16, 16], strides = [1, 1]} : vector<16x384xf32> to vector<16x16xf32>
    %40 = vector.shape_cast %39 : vector<16x16xf32> to vector<1x16x16xf32>
    %41 = vector.extract_strided_slice %4 {offsets = [0, 272], sizes = [16, 16], strides = [1, 1]} : vector<16x384xf32> to vector<16x16xf32>
    %42 = vector.shape_cast %41 : vector<16x16xf32> to vector<1x16x16xf32>
    %43 = vector.extract_strided_slice %4 {offsets = [0, 288], sizes = [16, 16], strides = [1, 1]} : vector<16x384xf32> to vector<16x16xf32>
    %44 = vector.shape_cast %43 : vector<16x16xf32> to vector<1x16x16xf32>
    %45 = vector.extract_strided_slice %4 {offsets = [0, 304], sizes = [16, 16], strides = [1, 1]} : vector<16x384xf32> to vector<16x16xf32>
    %46 = vector.shape_cast %45 : vector<16x16xf32> to vector<1x16x16xf32>
    %47 = vector.extract_strided_slice %4 {offsets = [0, 320], sizes = [16, 16], strides = [1, 1]} : vector<16x384xf32> to vector<16x16xf32>
    %48 = vector.shape_cast %47 : vector<16x16xf32> to vector<1x16x16xf32>
    %49 = vector.extract_strided_slice %4 {offsets = [0, 336], sizes = [16, 16], strides = [1, 1]} : vector<16x384xf32> to vector<16x16xf32>
    %50 = vector.shape_cast %49 : vector<16x16xf32> to vector<1x16x16xf32>
    %51 = vector.extract_strided_slice %4 {offsets = [0, 352], sizes = [16, 16], strides = [1, 1]} : vector<16x384xf32> to vector<16x16xf32>
    %52 = vector.shape_cast %51 : vector<16x16xf32> to vector<1x16x16xf32>
    %53 = vector.extract_strided_slice %4 {offsets = [0, 368], sizes = [16, 16], strides = [1, 1]} : vector<16x384xf32> to vector<16x16xf32>
    %54 = vector.shape_cast %53 : vector<16x16xf32> to vector<1x16x16xf32>
    %55 = tpu.concatenate %40, %42, %44, %46, %48, %50, %52, %54 in 0 : vector<1x16x16xf32>, vector<1x16x16xf32>, vector<1x16x16xf32>, vector<1x16x16xf32>, vector<1x16x16xf32>, vector<1x16x16xf32>, vector<1x16x16xf32>, vector<1x16x16xf32> -> vector<8x16x16xf32>
    "tpu.trace_start"() <{level = 10 : i32, message = "bqd,bkd->bqk"}> : () -> ()
    %cst_4 = arith.constant dense<0.000000e+00> : vector<8x16x16xf32>
    %56 = tpu.matmul %21, %38, %cst_4 {dimension_numbers = #tpu.dot_dimension_numbers<[2], [2], [1], [1], [0, 0, 0, 1, 1, 1], [0], [0]>} : vector<8x16x16xf32>, vector<8x16x16xf32>, vector<8x16x16xf32> -> vector<8x16x16xf32>
    "tpu.trace_stop"() : () -> ()
    %57 = vector.shape_cast %56 : vector<8x16x16xf32> to vector<8x1x16x16xf32>
    %c0_5 = arith.constant 0 : index
    %c0_6 = arith.constant 0 : index
    %c0_7 = arith.constant 0 : index
    %58 = vector.load %arg2[%c0_5, %c0_6, %c0_7] : memref<1x1x16xf32, #tpu.memory_space<vmem>>, vector<1x1x16xf32>
    %59 = vector.shape_cast %58 : vector<1x1x16xf32> to vector<1x1x1x16xf32>
    %60 = vector.broadcast %59 : vector<1x1x1x16xf32> to vector<8x1x16x16xf32>
    %61 = arith.addf %57, %60 : vector<8x1x16x16xf32>
    %62 = vector.shape_cast %61 : vector<8x1x16x16xf32> to vector<8x16x16xf32>
    %cst_8 = arith.constant dense<0xFF800000> : vector<8x16xf32>
    %63 = vector.multi_reduction <maximumf>, %62, %cst_8 [2] : vector<8x16x16xf32> to vector<8x16xf32>
    %64 = vector.shape_cast %63 : vector<8x16xf32> to vector<8x16x1xf32>
    %65 = vector.broadcast %64 : vector<8x16x1xf32> to vector<8x16x16xf32>
    %66 = arith.subf %62, %65 : vector<8x16x16xf32>
    %67 = math.exp %66 : vector<8x16x16xf32>
    %cst_9 = arith.constant dense<0.000000e+00> : vector<8x16xf32>
    %68 = vector.multi_reduction <add>, %67, %cst_9 [2] : vector<8x16x16xf32> to vector<8x16xf32>
    %69 = vector.shape_cast %68 : vector<8x16xf32> to vector<8x16x1xf32>
    %70 = arith.truncf %67 : vector<8x16x16xf32> to vector<8x16x16xbf16>
    %71 = arith.truncf %55 : vector<8x16x16xf32> to vector<8x16x16xbf16>
    "tpu.trace_start"() <{level = 10 : i32, message = "bqk,bkd->bqd"}> : () -> ()
    %cst_10 = arith.constant dense<0.000000e+00> : vector<8x16x16xf32>
    %72 = tpu.matmul %70, %71, %cst_10 {dimension_numbers = #tpu.dot_dimension_numbers<[2], [1], [1], [2], [0, 0, 0, 1, 1, 2], [0], [0]>} : vector<8x16x16xbf16>, vector<8x16x16xbf16>, vector<8x16x16xf32> -> vector<8x16x16xf32>
    "tpu.trace_stop"() : () -> ()
    %73 = vector.broadcast %69 : vector<8x16x1xf32> to vector<8x16x16xf32>
    %74 = arith.divf %72, %73 : vector<8x16x16xf32>
    %75 = vector.shape_cast %74 : vector<8x16x16xf32> to vector<8x1x16x16xf32>
    %76 = vector.extract_strided_slice %75 {offsets = [0, 0, 0, 0], sizes = [1, 1, 16, 16], strides = [1, 1, 1, 1]} : vector<8x1x16x16xf32> to vector<1x1x16x16xf32>
    %77 = vector.shape_cast %76 : vector<1x1x16x16xf32> to vector<1x16x16xf32>
    %78 = vector.extract_strided_slice %75 {offsets = [1, 0, 0, 0], sizes = [1, 1, 16, 16], strides = [1, 1, 1, 1]} : vector<8x1x16x16xf32> to vector<1x1x16x16xf32>
    %79 = vector.shape_cast %78 : vector<1x1x16x16xf32> to vector<1x16x16xf32>
    %80 = vector.extract_strided_slice %75 {offsets = [2, 0, 0, 0], sizes = [1, 1, 16, 16], strides = [1, 1, 1, 1]} : vector<8x1x16x16xf32> to vector<1x1x16x16xf32>
    %81 = vector.shape_cast %80 : vector<1x1x16x16xf32> to vector<1x16x16xf32>
    %82 = vector.extract_strided_slice %75 {offsets = [3, 0, 0, 0], sizes = [1, 1, 16, 16], strides = [1, 1, 1, 1]} : vector<8x1x16x16xf32> to vector<1x1x16x16xf32>
    %83 = vector.shape_cast %82 : vector<1x1x16x16xf32> to vector<1x16x16xf32>
    %84 = vector.extract_strided_slice %75 {offsets = [4, 0, 0, 0], sizes = [1, 1, 16, 16], strides = [1, 1, 1, 1]} : vector<8x1x16x16xf32> to vector<1x1x16x16xf32>
    %85 = vector.shape_cast %84 : vector<1x1x16x16xf32> to vector<1x16x16xf32>
    %86 = vector.extract_strided_slice %75 {offsets = [5, 0, 0, 0], sizes = [1, 1, 16, 16], strides = [1, 1, 1, 1]} : vector<8x1x16x16xf32> to vector<1x1x16x16xf32>
    %87 = vector.shape_cast %86 : vector<1x1x16x16xf32> to vector<1x16x16xf32>
    %88 = vector.extract_strided_slice %75 {offsets = [6, 0, 0, 0], sizes = [1, 1, 16, 16], strides = [1, 1, 1, 1]} : vector<8x1x16x16xf32> to vector<1x1x16x16xf32>
    %89 = vector.shape_cast %88 : vector<1x1x16x16xf32> to vector<1x16x16xf32>
    %90 = vector.extract_strided_slice %75 {offsets = [7, 0, 0, 0], sizes = [1, 1, 16, 16], strides = [1, 1, 1, 1]} : vector<8x1x16x16xf32> to vector<1x1x16x16xf32>
    %91 = vector.shape_cast %90 : vector<1x1x16x16xf32> to vector<1x16x16xf32>
    %92 = tpu.concatenate %77, %79, %81, %83, %85, %87, %89, %91 in 2 : vector<1x16x16xf32>, vector<1x16x16xf32>, vector<1x16x16xf32>, vector<1x16x16xf32>, vector<1x16x16xf32>, vector<1x16x16xf32>, vector<1x16x16xf32>, vector<1x16x16xf32> -> vector<1x16x128xf32>
    %93 = vector.shape_cast %92 : vector<1x16x128xf32> to vector<16x128xf32>
    %94 = arith.truncf %93 : vector<16x128xf32> to vector<16x128xbf16>
    %c0_11 = arith.constant 0 : index
    %c0_12 = arith.constant 0 : index
    %95 = vector.load %arg4[%c0_11, %c0_12] : memref<128x128xbf16, #tpu.memory_space<vmem>>, vector<128x128xbf16>
    %cst_13 = arith.constant dense<0.000000e+00> : vector<16x128xf32>
    %96 = tpu.matmul %94, %95, %cst_13 {dimension_numbers = #tpu.dot_dimension_numbers<[1], [0], [0], [1], [0, 0, 1, 1], [], []>} : vector<16x128xbf16>, vector<128x128xbf16>, vector<16x128xf32> -> vector<16x128xf32>
    %97 = vector.shape_cast %96 : vector<16x128xf32> to vector<1x16x128xf32>
    %c0_14 = arith.constant 0 : index
    %c0_15 = arith.constant 0 : index
    %c0_16 = arith.constant 0 : index
    %98 = vector.load %arg5[%c0_14, %c0_15, %c0_16] : memref<1x16x128xf32, #tpu.memory_space<vmem>>, vector<1x16x128xf32>
    tpu.vector_store %arg5[%c0_14, %c0_15, %c0_16], %97 {strides = array<i32>} : memref<1x16x128xf32, #tpu.memory_space<vmem>>, vector<1x16x128xf32>,
    return
  }
  func.func @transform_0(%arg0: i32) -> (i32, i32, i32) {
    %c0_i32 = arith.constant 0 : i32
    %c0_i32_0 = arith.constant 0 : i32
    %c0_i32_1 = arith.constant 0 : i32
    return %arg0, %c0_i32, %c0_i32_0 : i32, i32, i32
  }
  func.func @transform_1(%arg0: i32) -> (i32, i32, i32) {
    %c0_i32 = arith.constant 0 : i32
    %c0_i32_0 = arith.constant 0 : i32
    %c0_i32_1 = arith.constant 0 : i32
    return %arg0, %c0_i32, %c0_i32_0 : i32, i32, i32
  }
  func.func @transform_2(%arg0: i32) -> (i32, i32) {
    %c0_i32 = arith.constant 0 : i32
    %c0_i32_0 = arith.constant 0 : i32
    %c0_i32_1 = arith.constant 0 : i32
    return %c0_i32, %c0_i32_0 : i32, i32
  }
  func.func @transform_3(%arg0: i32) -> (i32, i32) {
    %c0_i32 = arith.constant 0 : i32
    %c0_i32_0 = arith.constant 0 : i32
    %c0_i32_1 = arith.constant 0 : i32
    return %c0_i32, %c0_i32_0 : i32, i32
  }
  func.func @transform_4(%arg0: i32) -> (i32, i32, i32) {
    %c0_i32 = arith.constant 0 : i32
    %c0_i32_0 = arith.constant 0 : i32
    %c0_i32_1 = arith.constant 0 : i32
    return %arg0, %c0_i32, %c0_i32_0 : i32, i32, i32
  }
}

</mosaic_0001>

<bundles_post_ra>
// kernel: mha_pallas.1
= control target key start
LH: loop header
LB: loop body
LE: loop exit
PB: predicated region body
PF: predicated region fallthrough
CT: control target
= control target key end

     0   :  { %9 = vsyncpa [#allocation3], 0  ;;  %s3183_s0 = inlined_call_operand.vmem [shape: f32[2,16,128], index: 0, kind: input, shape index: {}]   ;;  %s3184_s1 = inlined_call_operand.vmem [shape: f32[2,1,16], index: 1, kind: input, shape index: {}]   ;;  %s3185_s2 = inlined_call_operand.vmem [shape: bf16[128,384], index: 2, kind: input, shape index: {}]   ;;  %s3186_s3 = inlined_call_operand.vmem [shape: bf16[128,128], index: 3, kind: input, shape index: {}]   ;;  %s3187_s4 = inlined_call_operand.hbm [shape: f32[2,16,128], index: 4, kind: output, shape index: {}]  }
   0x1   :  { %11 = vsyncpa [#allocation3 + $0x1], 0  ;;  %s2685_s15 = smov 0   ;;  %s2687_s16 = smov 0  }
   0x2   :  { %s2689_s17 = smov 0   ;;  %s2691_s18 = smov 0  }
   0x3 LB: > { %s2706_s19 = sadd.s32 4294967295, %s2645_s18   ;;  %s2063_s20 = sadd.s32 4294967294, %s2645_s18   ;;  %s2645_s18 = sphi %s2691_s18, %s3193_s18   ;;  %s2641_s17 = sphi %s2689_s17, %s3192_s17   ;;  %s2637_s16 = sphi %s2687_s16, %s3191_s16   ;;  %s2633_s15 = sphi %s2685_s15, %s3190_s15  }
   0x4   : > { %s2710_s21 = sadd.s32 1, %s2645_s18   ;;  %s118_s22 = sadd.s32 1, %s2641_s17 }
   0x5   : > { %s115_s23 = ssub.s32 %s2645_s18, %s2710_s21  ;;  %p128_p0 = scmp.ne.s32.totalorder %s2641_s17, %s2637_s16 }
   0x6   : > { %p116_p1 = scmp.eq.s32.totalorder %s115_s23, 0  ;;  %p129_p2 = scmp.eq.s32.totalorder %s2706_s19, 1 }
   0x7   : > { %p134_p3 = scmp.ne.s32.totalorder %s2637_s16, %s2633_s15  ;;  %p135_p4 = scmp.eq.s32.totalorder %s2063_s20, 1 }
   0x8   : > { %s2721_s24 = scalar_select %p116_p1, %s2641_s17, %s118_s22  }
   0x9   : > { %p2723_p5 = por %p129_p2, %p128_p0  ;;  %p2727_p6 = por %p135_p4, %p134_p3 }
   0xa   : > { %p2066_p7 = scmp.ge.s32.totalorder %s2645_s18, 1  ;;  %p173_p8 = scmp.lt.s32.totalorder %s2645_s18, 3 }
   0xc   : > { %p174_p9 = pnand %p2066_p7, %p173_p8 }
   0xd   : > { %p202_p10 = scmp.lt.s32.totalorder (!%p174_p9), %s2706_s19, 1  ;;  %s2650_s6 = smov (!%p174_p9), 96  }
   0xe   : > { %177 = sbr.rel (%p174_p9) target bundleno = 1364 (0x554), region = 36  ;;  %s2651_s7 = smov (!%p174_p9), 112  }
   0xf   : > { %s2652_s8 = smov (!%p174_p9), 80   ;;  %s2653_s9 = smov (!%p174_p9), 48  }
  0x10   : > { %s2654_s10 = smov (!%p174_p9), 64   ;;  %s2656_s12 = smov (!%p174_p9), 32  }
  0x13   : > { %v2481_v0 = vld [vmem:[%s3185_s2 + $0xac] ss:$12 sps:$4 sm:$0xff]   ;;  %v2483_v1 = vld [vmem:[%s3185_s2 + $0xa8] ss:$12 sps:$4 sm:$0xff]   ;;  %v2647_v2 = vmov 0   ;;  %v2648_v4 = vmov 0.0  }
  0x14   : > { %406 = vmatprep.mubr.bf16.mxu0 %v2647_v2  ;;  %374 = vmatprep.subr.bf16.mxu0 %v2481_v0  ;;  %v2484_v3 = vld [vmem:[%s3185_s2 + $0x94] ss:$12 sps:$4 sm:$0xff]   ;;  %v2486_v5 = vld [vmem:[%s3185_s2 + $0x90] ss:$12 sps:$4 sm:$0xff]   ;;  %vm2649_vm0 = vmmov 0   ;;  %s2759_s20 = scalar_select %p202_p10, %s2706_s19, 1 }
  0x15   : > { %2216 = vmatprep.subr.bf16.mxu1 %v2648_v4  ;;  %375 = vmatpush1.bf16.msra.mxu0 %v2483_v1  ;;  %v2487_v6 = vld [vmem:[%s3185_s2 + $0x7c] ss:$12 sps:$4 sm:$0xff]   ;;  %v2489_v7 = vld [vmem:[%s3185_s2 + $0x78] ss:$12 sps:$4 sm:$0xff]   ;;  %v2492_v9 = vld [vmem:[%s3185_s2 + $0x60] ss:$12 sps:$4 sm:$0xff]  }
  0x16   : > { %2232 = vmatprep.mubr.msk.bf16.mxu1 %vm2649_vm0, %v2648_v4  ;;  %376 = vmatprep.subr.bf16.mxu0 %v2484_v3  ;;  %v2490_v8 = vld [vmem:[%s3185_s2 + $0x64] ss:$12 sps:$4 sm:$0xff]   ;;  %v2493_v10 = vld [vmem:[%s3185_s2 + $0x4c] ss:$12 sps:$4 sm:$0xff]   ;;  %s2148_s5 = sshll.u32 %s2759_s20, 4  ;;  %vm562_vm1 = vcmask 130048   ;;  %s209_s22 = scalar_lea.vmem %s3184_s1, %s2759_s20 }
  0x17   : > { %v2505_v11 = vld [vmem:[%s3185_s2 + $0xb0] ss:$12 sps:$4 sm:$0xff]   ;;  %v2506_v12 = vld [vmem:[%s3185_s2 + $0x98] ss:$12 sps:$4 sm:$0xff]   ;;  %v2495_v13 = vld [vmem:[%s3185_s2 + $0x48] ss:$12 sps:$4 sm:$0xff]   ;;  %s206_s11 = scalar_lea.vmem %s3183_s0, %s2148_s5 }
  0x18   : > { %2217 = vmatpush3.bf16.msra.mxu1 %v2505_v11  ;;  %v2496_v14 = vld [vmem:[%s3185_s2 + $0x34] ss:$12 sps:$4 sm:$0xff]   ;;  %v2498_v15 = vld [vmem:[%s3185_s2 + $0x30] ss:$12 sps:$4 sm:$0xff]   ;;  %v2501_v19 = vld [vmem:[%s3185_s2 + $0x18] ss:$12 sps:$4 sm:$0xff]  }
  0x19   : > { %377 = vmatpush1.bf16.msra.mxu0 %v2486_v5  ;;  %2218 = vmatprep.subr.bf16.mxu1 %v2648_v4  ;;  %v2507_v16 = vld [vmem:[%s3185_s2 + $0x80] ss:$12 sps:$4 sm:$0xff]   ;;  %v2499_v17 = vld [vmem:[%s3185_s2 + $0x1c] ss:$12 sps:$4 sm:$0xff]   ;;  %v2502_v20 = vld [vmem:[%s3185_s2 + $0x4] ss:$12 sps:$4 sm:$0xff]  }
  0x1a   : > { %378 = vmatprep.subr.bf16.mxu0 %v2487_v6  ;;  %v2508_v18 = vld [vmem:[%s3185_s2 + $0x68] ss:$12 sps:$4 sm:$0xff]   ;;  %v2509_v21 = vld [vmem:[%s3185_s2 + $0x50] ss:$12 sps:$4 sm:$0xff]   ;;  %v2504_v22 = vld [vmem:[%s3185_s2] ss:$12 sps:$4 sm:$0xff]  }
  0x1b   : > { %v211_v23 = vld [vmem:[%s206_s11] sm:$0xff]  ;;  %v212_v24 = vld [vmem:[%s206_s11 + $0x8] sm:$0xff]  ;;  %s2655_s11 = smov 16   ;;  %vm1852_vm2 = vcmask 261120   ;;  %vm1855_vm3 = vcmask 392192   ;;  %vm1858_vm4 = vcmask 523264  }
  0x1c   : > { %2219 = vmatpush3.bf16.msra.mxu1 %v2506_v12  ;;  %v213_v25 = vpack.c.bf16 %v212_v24, %v211_v23  ;;  %v2510_v26 = vld [vmem:[%s3185_s2 + $0x38] ss:$12 sps:$4 sm:$0xff]   ;;  %v2511_v27 = vld [vmem:[%s3185_s2 + $0x20] ss:$12 sps:$4 sm:$0xff]   ;;  %v2512_v28 = vld [vmem:[%s3185_s2 + $0x8] ss:$12 sps:$4 sm:$0xff]  }
  0x1d   : > { %379 = vmatpush1.bf16.msra.mxu0 %v2489_v7  ;;  %2220 = vmatprep.subr.bf16.mxu1 %v2648_v4  ;;  %v2928_v5 = vld [vmem:[%s209_s22] ss:$0 sm:$0xff]  ;;  %vm1861_vm5 = vcmask 654336   ;;  %vm1864_vm6 = vcmask 785408   ;;  %vm1867_vm7 = vcmask 916480   ;;  %s2149_s5 = sshll.u32 %s2706_s19, 8 }
  0x1e   : > { %380 = vmatprep.subr.bf16.mxu0 %v2490_v8  ;;  %s3141_s30 = scalar_lea.hbm %s3187_s4, %s2149_s5  ;;  %s2657_s19 = smov [#allocation2]  }
  0x20   : > { %2221 = vmatpush3.bf16.msra.mxu1 %v2507_v16 }
  0x21   : > { %381 = vmatpush1.bf16.msra.mxu0 %v2492_v9  ;;  %2222 = vmatprep.subr.bf16.mxu1 %v2648_v4 }
  0x22   : > { %382 = vmatprep.subr.bf16.mxu0 %v2493_v10 }
  0x24   : > { %2223 = vmatpush3.bf16.msra.mxu1 %v2508_v18 }
  0x25   : > { %383 = vmatpush1.bf16.msra.mxu0 %v2495_v13  ;;  %2224 = vmatprep.subr.bf16.mxu1 %v2648_v4 }
  0x26   : > { %384 = vmatprep.subr.bf16.mxu0 %v2496_v14 }
  0x28   : > { %2225 = vmatpush3.bf16.msra.mxu1 %v2509_v21 }
  0x29   : > { %385 = vmatpush1.bf16.msra.mxu0 %v2498_v15  ;;  %2226 = vmatprep.subr.bf16.mxu1 %v2648_v4 }
  0x2a   : > { %386 = vmatprep.subr.bf16.mxu0 %v2499_v17 }
  0x2c   : > { %2227 = vmatpush3.bf16.msra.mxu1 %v2510_v26 }
  0x2d   : > { %387 = vmatpush1.bf16.msra.mxu0 %v2501_v19  ;;  %2228 = vmatprep.subr.bf16.mxu1 %v2648_v4 }
  0x2e   : > { %388 = vmatprep.subr.bf16.mxu0 %v2502_v20 }
  0x30   : > { %2229 = vmatpush3.bf16.msra.mxu1 %v2511_v27 }
  0x31   : > { %389 = vmatpush1.bf16.msra.mxu0 %v2504_v22  ;;  %2230 = vmatprep.subr.bf16.mxu1 %v2648_v4 }
  0x34   : > { %407 = vmatmul.mubr.bf16.vlgmr.msra.gmra.mxu0 %v213_v25  ;;  %2231 = vmatpush3.bf16.msra.mxu1 %v2512_v28 }
  0x37   : > { %2233 = vmatmul.mubr.bf16.vlgmr.msra.gmra.mxu1 %v213_v25 }
  0xf4   : > { %v408_v29 = vpop.f32.mrf.mxu0 }
  0xf5   : > { %464 = vrot.lane.b32.xlu0 %v408_v29, %s2650_s6  ;;  %460 = vrot.lane.b32.xlu1 %v408_v29, %s2651_s7 }
  0xf6   : > { %2240 = vmatprep.mubr.msk.f32.mxu1 %vm562_vm1, %v408_v29  ;;  %v410_v30 = vpop.f32.mrf.mxu0 }
  0xf7   : > { %v2845_v33 = vpop.f32.mrf.mxu1 }
  0xf8   : > { %v412_v31 = vpop.f32.mrf.mxu0 }
  0xf9   : > { %494 = vrot.lane.b32.xlu1 %v410_v30, %s2650_s6  ;;  %490 = vrot.lane.b32.xlu0 %v410_v30, %s2651_s7  ;;  %v2234_v34 = vpop.f32.mrf.mxu1 }
  0xfa   : > { %v414_v32 = vpop.f32.mrf.mxu0 }
  0xfb   : > { %2236 = vmatprep.subr.msk.mxu1 %vm562_vm1, %v414_v32  ;;  %v2849_v35 = vpop.f32.mrf.mxu1 }
  0xfc   : > { %2237 = vmatpush3.xpose.msk.msra.mxu1 %vm562_vm1, %v414_v32  ;;  %v2863_v37 = vpack.i.bf16 %v2849_v35, %v2845_v33  ;;  %v1402_v62 = vpack.c.bf16 %v2849_v35, %v2845_v33 }
  0xfd   : > { %498 = vrot.lane.b32.xlu1 %v410_v30, %s2652_s8  ;;  %462 = vrot.lane.b32.xlu0 %v412_v31, %s2651_s7  ;;  %v2235_v36 = vpop.f32.mrf.mxu1 }
  0xfe   : > { %2238 = vmatprep.subr.msk.mxu1 %vm562_vm1, %v410_v30 }
 0x100   : > { %2239 = vmatpush3.xpose.msk.msra.mxu1 %vm562_vm1, %v410_v30 }
 0x101   : > { %506 = vrot.lane.b32.xlu1 %v410_v30, %s2653_s9  ;;  %492 = vrot.lane.b32.xlu0 %v414_v32, %s2651_s7 }
 0x103   : > { %2241 = vmatmul.mubr.msk.f32.vlgmr.msra.gmra.mxu1 %vm562_vm1, %v412_v31 }
 0x105   : > { %474 = vrot.lane.b32.xlu1 %v412_v31, %s2654_s10  ;;  %466 = vrot.lane.b32.xlu0 %v412_v31, %s2650_s6 }
 0x109   : > { %496 = vrot.lane.b32.xlu1 %v414_v32, %s2650_s6  ;;  %468 = vrot.lane.b32.xlu0 %v408_v29, %s2652_s8 }
 0x10d   : > { %514 = vrot.lane.b32.xlu1 %v410_v30, %s2655_s11  ;;  %470 = vrot.lane.b32.xlu0 %v412_v31, %s2652_s8 }
 0x111   : > { %500 = vrot.lane.b32.xlu1 %v414_v32, %s2652_s8  ;;  %502 = vrot.lane.b32.xlu0 %v410_v30, %s2654_s10 }
 0x115   : > { %504 = vrot.lane.b32.xlu1 %v414_v32, %s2654_s10  ;;  %472 = vrot.lane.b32.xlu0 %v408_v29, %s2654_s10 }
 0x119   : > { %508 = vrot.lane.b32.xlu1 %v414_v32, %s2653_s9  ;;  %476 = vrot.lane.b32.xlu0 %v408_v29, %s2653_s9 }
 0x11d   : > { %512 = vrot.lane.b32.xlu1 %v414_v32, %s2656_s12  ;;  %478 = vrot.lane.b32.xlu0 %v412_v31, %s2653_s9 }
 0x121   : > { %516 = vrot.lane.b32.xlu1 %v414_v32, %s2655_s11  ;;  %510 = vrot.lane.b32.xlu0 %v410_v30, %s2656_s12 }
 0x125   : > { %482 = vrot.lane.b32.xlu1 %v412_v31, %s2656_s12  ;;  %480 = vrot.lane.b32.xlu0 %v408_v29, %s2656_s12 }
 0x129   : > { %486 = vrot.lane.b32.xlu1 %v412_v31, %s2655_s11  ;;  %484 = vrot.lane.b32.xlu0 %v408_v29, %s2655_s11 }
 0x12d   : > { %2412 = vrot.lane.b32.xlu1 %v2863_v37, %s2651_s7  ;;  %2417 = vrot.lane.b32.xlu0 %v2863_v37, %s2650_s6 }
 0x131   : > { %2422 = vrot.lane.b32.xlu1 %v2863_v37, %s2652_s8 }
 0x135   : > { %2427 = vrot.lane.b32.xlu1 %v2863_v37, %s2654_s10 }
 0x167   : > { %v465_v38 = vpop.permute.xlu0 %464  ;;  %v461_v39 = vpop.permute.xlu1 %460 }
 0x168   : > { %2247 = vmatprep.mubr.msk.f32.mxu1 %vm562_vm1, %v461_v39 }
 0x16b   : > { %v495_v40 = vpop.permute.xlu1 %494  ;;  %v491_v41 = vpop.permute.xlu0 %490 }
 0x16f   : > { %v499_v42 = vpop.permute.xlu1 %498  ;;  %v463_v43 = vpop.permute.xlu0 %462 }
 0x173   : > { %v507_v44 = vpop.permute.xlu1 %506  ;;  %v493_v45 = vpop.permute.xlu0 %492 }
 0x174   : > { %2243 = vmatprep.subr.msk.mxu1 %vm562_vm1, %v493_v45 }
 0x175   : > { %2244 = vmatpush3.xpose.msk.msra.mxu1 %vm562_vm1, %v493_v45 }
 0x176   : > { %2245 = vmatprep.subr.msk.mxu1 %vm562_vm1, %v491_v41 }
 0x177   : > { %v475_v46 = vpop.permute.xlu1 %474  ;;  %v467_v47 = vpop.permute.xlu0 %466 }
 0x179   : > { %2246 = vmatpush3.xpose.msk.msra.mxu1 %vm562_vm1, %v491_v41 }
 0x17b   : > { %v497_v48 = vpop.permute.xlu1 %496  ;;  %v469_v49 = vpop.permute.xlu0 %468 }
 0x17c   : > { %2248 = vmatmul.mubr.msk.f32.vlgmr.msra.gmra.mxu1 %vm562_vm1, %v463_v43  ;;  %2250 = vmatprep.subr.msk.mxu1 %vm562_vm1, %v497_v48 }
 0x17d   : > { %2251 = vmatpush3.xpose.msk.msra.mxu1 %vm562_vm1, %v497_v48  ;;  %2254 = vmatprep.mubr.msk.f32.mxu1 %vm562_vm1, %v465_v38 }
 0x17e   : > { %2252 = vmatprep.subr.msk.mxu1 %vm562_vm1, %v495_v40 }
 0x17f   : > { %v515_v50 = vpop.permute.xlu1 %514  ;;  %v471_v51 = vpop.permute.xlu0 %470 }
 0x181   : > { %2253 = vmatpush3.xpose.msk.msra.mxu1 %vm562_vm1, %v495_v40 }
 0x183   : > { %v501_v52 = vpop.permute.xlu1 %500  ;;  %v503_v53 = vpop.permute.xlu0 %502 }
 0x184   : > { %2255 = vmatmul.mubr.msk.f32.vlgmr.msra.gmra.mxu1 %vm562_vm1, %v467_v47  ;;  %2257 = vmatprep.subr.msk.mxu1 %vm562_vm1, %v501_v52 }
 0x185   : > { %2258 = vmatpush3.xpose.msk.msra.mxu1 %vm562_vm1, %v501_v52  ;;  %2261 = vmatprep.mubr.msk.f32.mxu1 %vm562_vm1, %v469_v49 }
 0x186   : > { %2259 = vmatprep.subr.msk.mxu1 %vm562_vm1, %v499_v42 }
 0x187   : > { %v505_v54 = vpop.permute.xlu1 %504  ;;  %v473_v55 = vpop.permute.xlu0 %472 }
 0x188   : > { %2264 = vmatprep.subr.msk.mxu0 %vm562_vm1, %v505_v54  ;;  %2268 = vmatprep.mubr.msk.f32.mxu0 %vm562_vm1, %v473_v55 }
 0x189   : > { %2260 = vmatpush3.xpose.msk.msra.mxu1 %vm562_vm1, %v499_v42  ;;  %2265 = vmatpush3.xpose.msk.msra.mxu0 %vm562_vm1, %v505_v54 }
 0x18a   : > { %2266 = vmatprep.subr.msk.mxu0 %vm562_vm1, %v503_v53 }
 0x18b   : > { %v509_v56 = vpop.permute.xlu1 %508  ;;  %v477_v57 = vpop.permute.xlu0 %476 }
 0x18c   : > { %2262 = vmatmul.mubr.msk.f32.vlgmr.msra.gmra.mxu1 %vm562_vm1, %v471_v51  ;;  %2271 = vmatprep.subr.msk.mxu1 %vm562_vm1, %v509_v56 }
 0x18d   : > { %2267 = vmatpush3.xpose.msk.msra.mxu0 %vm562_vm1, %v503_v53  ;;  %2272 = vmatpush3.xpose.msk.msra.mxu1 %vm562_vm1, %v509_v56 }
 0x18e   : > { %2275 = vmatprep.mubr.msk.f32.mxu1 %vm562_vm1, %v477_v57  ;;  %2273 = vmatprep.subr.msk.mxu1 %vm562_vm1, %v507_v44 }
 0x18f   : > { %v513_v58 = vpop.permute.xlu1 %512  ;;  %v479_v59 = vpop.permute.xlu0 %478 }
 0x190   : > { %2269 = vmatmul.mubr.msk.f32.vlgmr.msra.gmra.mxu0 %vm562_vm1, %v475_v46  ;;  %2278 = vmatprep.subr.msk.mxu0 %vm562_vm1, %v513_v58 }
 0x191   : > { %2274 = vmatpush3.xpose.msk.msra.mxu1 %vm562_vm1, %v507_v44  ;;  %2279 = vmatpush3.xpose.msk.msra.mxu0 %vm562_vm1, %v513_v58 }
 0x193   : > { %v517_v60 = vpop.permute.xlu1 %516  ;;  %v511_v61 = vpop.permute.xlu0 %510 }
 0x194   : > { %2276 = vmatmul.mubr.msk.f32.vlgmr.msra.gmra.mxu1 %vm562_vm1, %v479_v59  ;;  %2280 = vmatprep.subr.msk.mxu0 %vm562_vm1, %v511_v61 }
 0x195   : > { %2285 = vmatprep.subr.msk.mxu1 %vm562_vm1, %v517_v60  ;;  %2281 = vmatpush3.xpose.msk.msra.mxu0 %vm562_vm1, %v511_v61 }
 0x196   : > { %2286 = vmatpush3.xpose.msk.msra.mxu1 %vm562_vm1, %v517_v60  ;;  %2292 = vmatprep.subr.bf16.mxu0 %v2648_v4 }
 0x197   : > { %2287 = vmatprep.subr.msk.mxu1 %vm562_vm1, %v515_v50  ;;  %v483_v63 = vpop.permute.xlu1 %482  ;;  %v481_v0 = vpop.permute.xlu0 %480 }
 0x198   : > { %2282 = vmatprep.mubr.msk.f32.mxu0 %vm562_vm1, %v481_v0 }
 0x199   : > { %2283 = vmatmul.mubr.msk.f32.vlgmr.msra.gmra.mxu0 %vm562_vm1, %v483_v63 }
 0x19a   : > { %2288 = vmatpush3.xpose.msk.msra.mxu1 %vm562_vm1, %v515_v50  ;;  %2293 = vmatpush3.bf16.msra.mxu0 %v1402_v62 }
 0x19b   : > { %v487_v1 = vpop.permute.xlu1 %486  ;;  %v485_v2 = vpop.permute.xlu0 %484  ;;  %2294 = vmatprep.mubr.msk.bf16.mxu0 %vm2649_vm0, %v2648_v4  ;;  %2298 = vmatprep.subr.bf16.mxu1 %v2648_v4 }
 0x19c   : > { %2289 = vmatprep.mubr.msk.f32.mxu1 %vm562_vm1, %v485_v2  ;;  %2304 = vmatprep.subr.bf16.mxu0 %v2648_v4 }
 0x19d   : > { %2290 = vmatmul.mubr.msk.f32.vlgmr.msra.gmra.mxu1 %vm562_vm1, %v487_v1 }
 0x19e   : > { %2300 = vmatprep.mubr.msk.bf16.mxu1 %vm2649_vm0, %v2648_v4 }
 0x19f   : > { %v2413_v3 = vpop.permute.xlu1 %2412  ;;  %v2418_v21 = vpop.permute.xlu0 %2417 }
 0x1a0   : > { %v2415_v6 = vunpack.i.h.bf16 %v2413_v3  ;;  %v2414_v7 = vunpack.i.l.bf16 %v2413_v3  ;;  %v2420_v56 = vunpack.i.h.bf16 %v2418_v21  ;;  %v2419_v57 = vunpack.i.l.bf16 %v2418_v21 }
 0x1a2   : > { %v1403_v9 = vpack.c.bf16 %v2415_v6, %v2414_v7  ;;  %v1404_v0 = vpack.c.bf16 %v2420_v56, %v2419_v57 }
 0x1a3   : > { %v2940_v18 = vpop.permute.xlu1 %2422 }
 0x1a4   : > { %2299 = vmatpush3.bf16.msra.mxu1 %v1403_v9 }
 0x1a5   : > { %2310 = vmatprep.subr.bf16.mxu1 %v2648_v4 }
 0x1a7   : > { %v2942_v19 = vpop.permute.xlu1 %2427 }
 0x1c3   : > { %v2242_v8 = vpop.f32.mrf.mxu1 }
 0x1c4   : > { %v1235_v10 = vadd.f32 %v2242_v8, %v2928_v5 }
 0x1c5   : > { %v637_v11 = vpop.f32.mrf.mxu1 }
 0x1c6   : > { %v1234_v12 = vadd.f32 %v2928_v5, %v637_v11  ;;  %v1253_v13 = vsel %vm562_vm1, %v1235_v10, -inf }
 0x1c7   : > { %1254 = vmax.xlane.f32.xlu1 %v1253_v13 }
 0x1c8   : > { %v1250_v14 = vsel %vm562_vm1, %v1234_v12, -inf }
 0x1c9   : > { %1251 = vmax.xlane.f32.xlu0 %v1250_v14 }
 0x23c   : > { %v2249_v15 = vpop.f32.mrf.mxu1 }
 0x23d   : > { %v2936_v16 = vadd.f32 %v2249_v15, %v2928_v5 }
 0x23e   : > { %v720_v20 = vpop.f32.mrf.mxu1 }
 0x23f   : > { %v1259_v17 = vsel %vm562_vm1, %v2936_v16, -inf  ;;  %v2948_v28 = vadd.f32 %v2928_v5, %v720_v20 }
 0x240   : > { %1260 = vmax.xlane.f32.xlu0 %v1259_v17 }
 0x241   : > { %v1256_v42 = vsel %vm562_vm1, %v2948_v28, -inf }
 0x244   : > { %v2256_v22 = vpop.f32.mrf.mxu1 }
 0x245   : > { %v2961_v40 = vadd.f32 %v2256_v22, %v2928_v5 }
 0x246   : > { %v803_v25 = vpop.f32.mrf.mxu1 }
 0x247   : > { %v2956_v36 = vadd.f32 %v2928_v5, %v803_v25  ;;  %v1265_v48 = vsel %vm562_vm1, %v2961_v40, -inf }
 0x249   : > { %v1262_v45 = vsel %vm562_vm1, %v2956_v36, -inf }
 0x24c   : > { %v2263_v31 = vpop.f32.mrf.mxu1 }
 0x24d   : > { %v2981_v53 = vadd.f32 %v2263_v31, %v2928_v5 }
 0x24e   : > { %v886_v41 = vpop.f32.mrf.mxu1 }
 0x24f   : > { %v2976_v51 = vadd.f32 %v2928_v5, %v886_v41  ;;  %v1271_v62 = vsel %vm562_vm1, %v2981_v53, -inf }
 0x250   : > { %v2270_v23 = vpop.f32.mrf.mxu0  ;;  %v1255_v24 = vpop.xlane.xlu1 %1254 }
 0x251   : > { %v2945_v26 = vadd.f32 %v2270_v23, %v2928_v5  ;;  %v1299_v27 = vsub.f32 %v1235_v10, %v1255_v24  ;;  %v1268_v59 = vsel %vm562_vm1, %v2976_v51, -inf }
 0x252   : > { %v969_v29 = vpop.f32.mrf.mxu0  ;;  %v1252_v30 = vpop.xlane.xlu0 %1251 }
 0x253   : > { %v1316_v32 = vmul.f32 1.442695, %v1299_v27  ;;  %v2951_v33 = vadd.f32 %v2928_v5, %v969_v29  ;;  %v1298_v34 = vsub.f32 %v1234_v12, %v1252_v30  ;;  %v1277_v35 = vsel %vm562_vm1, %v2945_v26, -inf }
 0x254   : > { %1278 = vmax.xlane.f32.xlu0 %v1277_v35  ;;  %v2277_v43 = vpop.f32.mrf.mxu1 }
 0x255   : > { %v1314_v38 = vmul.f32 1.442695, %v1298_v34  ;;  %v1274_v39 = vsel %vm562_vm1, %v2951_v33, -inf  ;;  %2521 = vpow2.f32 %v1316_v32  ;;  %v3014_v7 = vadd.f32 %v2277_v43, %v2928_v5 }
 0x256   : > { %1275 = vmax.xlane.f32.xlu1 %v1274_v39  ;;  %v1052_v50 = vpop.f32.mrf.mxu1 }
 0x257   : > { %2523 = vpow2.f32 %v1314_v38  ;;  %v2986_v58 = vadd.f32 %v2928_v5, %v1052_v50  ;;  %v1283_v9 = vsel %vm562_vm1, %v3014_v7, -inf }
 0x258   : > { %1257 = vmax.xlane.f32.xlu0 %v1256_v42 }
 0x259   : > { %v2284_v44 = vpop.f32.mrf.mxu0  ;;  %v1280_v3 = vsel %vm562_vm1, %v2986_v58, -inf }
 0x25a   : > { %1263 = vmax.xlane.f32.xlu1 %v1262_v45  ;;  %v2968_v46 = vadd.f32 %v2284_v44, %v2928_v5  ;;  %v2425_v44 = vunpack.i.h.bf16 %v2940_v18  ;;  %v2424_v45 = vunpack.i.l.bf16 %v2940_v18 }
 0x25b   : > { %v1135_v47 = vpop.f32.mrf.mxu0 }
 0x25c   : > { %v2973_v49 = vadd.f32 %v2928_v5, %v1135_v47  ;;  %1266 = vmax.xlane.f32.xlu0 %v1265_v48  ;;  %v1289_v55 = vsel %vm562_vm1, %v2968_v46, -inf }
 0x25d   : > { %v2291_v54 = vpop.f32.mrf.mxu1 }
 0x25e   : > { %v1286_v52 = vsel %vm562_vm1, %v2973_v49, -inf  ;;  %v3017_v8 = vadd.f32 %v2291_v54, %v2928_v5  ;;  %v1405_v54 = vpack.c.bf16 %v2425_v44, %v2424_v45 }
 0x25f   : > { %1287 = vmax.xlane.f32.xlu1 %v1286_v52  ;;  %v1218_v61 = vpop.f32.mrf.mxu1 }
 0x260   : > { %1290 = vmax.xlane.f32.xlu0 %v1289_v55  ;;  %v2999_v2 = vadd.f32 %v2928_v5, %v1218_v61  ;;  %v1295_v10 = vsel %vm562_vm1, %v3017_v8, -inf  ;;  %v2429_v61 = vunpack.i.l.bf16 %v2942_v19 }
 0x262   : > { %v2990_v60 = vpop.eup %2521  ;;  %v1292_v6 = vsel %vm562_vm1, %v2999_v2, -inf }
 0x263   : > { %1269 = vmax.xlane.f32.xlu1 %v1268_v59  ;;  %v2430_v59 = vunpack.i.h.bf16 %v2942_v19 }
 0x264   : > { %v2994_v63 = vpop.eup %2523  ;;  %1272 = vmax.xlane.f32.xlu0 %v1271_v62 }
 0x265   : > { %v1394_v1 = vpack.c.bf16 %v2990_v60, %v2994_v63  ;;  %v1406_v19 = vpack.c.bf16 %v2430_v59, %v2429_v61 }
 0x267   : > { %2295 = vmatmul.mubr.msk.bf16.vlgmr.msra.gmra.mxu0 %vm562_vm1, %v1394_v1  ;;  %1281 = vmax.xlane.f32.xlu1 %v1280_v3 }
 0x268   : > { %2305 = vmatpush3.bf16.msra.mxu0 %v1404_v0  ;;  %2306 = vmatprep.mubr.msk.bf16.mxu0 %vm2649_vm0, %v2648_v4 }
 0x269   : > { %2316 = vmatprep.subr.bf16.mxu0 %v2648_v4 }
 0x26b   : > { %1293 = vmax.xlane.f32.xlu1 %v1292_v6 }
 0x27a   : > { %2432 = vrot.lane.b32.xlu0 %v2863_v37, %s2653_s9 }
 0x27c   : > { %2437 = vrot.lane.b32.xlu1 %v2863_v37, %s2656_s12 }
 0x299   : > { %1284 = vmax.xlane.f32.xlu0 %v1283_v9 }
 0x29d   : > { %1296 = vmax.xlane.f32.xlu0 %v1295_v10 }
 0x2b3   : > { %2442 = vrot.lane.b32.xlu0 %v2863_v37, %s2655_s11 }
 0x2c9   : > { %v1261_v11 = vpop.xlane.xlu0 %1260 }
 0x2ca   : > { %v1301_v12 = vsub.f32 %v2936_v16, %v1261_v11 }
 0x2cc   : > { %v1320_v13 = vmul.f32 1.442695, %v1301_v12 }
 0x2ce   : > { %2525 = vpow2.f32 %v1320_v13 }
 0x2db   : > { %v2526_v14 = vpop.eup %2525 }
 0x2dc   : > { %v1355_v5 = vsel %vm562_vm1, %v2526_v14, 0.0 }
 0x2dd   : > { %v1279_v15 = vpop.xlane.xlu0 %1278  ;;  %1356 = vadd.xlane.f32.xlu0 %v1355_v5 }
 0x2de   : > { %v1307_v17 = vsub.f32 %v2945_v26, %v1279_v15 }
 0x2df   : > { %v1276_v20 = vpop.xlane.xlu1 %1275 }
 0x2e0   : > { %v1332_v21 = vmul.f32 1.442695, %v1307_v17  ;;  %v1306_v22 = vsub.f32 %v2951_v33, %v1276_v20 }
 0x2e1   : > { %v1258_v23 = vpop.xlane.xlu0 %1257 }
 0x2e2   : > { %2527 = vpow2.f32 %v1332_v21  ;;  %v1330_v24 = vmul.f32 1.442695, %v1306_v22  ;;  %v1300_v37 = vsub.f32 %v2948_v28, %v1258_v23 }
 0x2e3   : > { %v1264_v25 = vpop.xlane.xlu1 %1263 }
 0x2e4   : > { %2529 = vpow2.f32 %v1330_v24  ;;  %v1318_v16 = vmul.f32 1.442695, %v1300_v37  ;;  %v1302_v27 = vsub.f32 %v2956_v36, %v1264_v25 }
 0x2e5   : > { %v1267_v29 = vpop.xlane.xlu0 %1266 }
 0x2e6   : > { %2531 = vpow2.f32 %v1318_v16  ;;  %v1322_v30 = vmul.f32 1.442695, %v1302_v27  ;;  %v1303_v31 = vsub.f32 %v2961_v40, %v1267_v29 }
 0x2e8   : > { %2533 = vpow2.f32 %v1322_v30  ;;  %v1324_v26 = vmul.f32 1.442695, %v1303_v31  ;;  %v1288_v32 = vpop.xlane.xlu1 %1287 }
 0x2e9   : > { %v1310_v33 = vsub.f32 %v2973_v49, %v1288_v32  ;;  %v1291_v34 = vpop.xlane.xlu0 %1290  ;;  %v1346_v32 = vsel %vm562_vm1, %v2994_v63, 0.0 }
 0x2ea   : > { %2535 = vpow2.f32 %v1324_v26  ;;  %v1311_v35 = vsub.f32 %v2968_v46, %v1291_v34 }
 0x2eb   : > { %v1338_v28 = vmul.f32 1.442695, %v1310_v33 }
 0x2ec   : > { %v1340_v38 = vmul.f32 1.442695, %v1311_v35  ;;  %v1270_v39 = vpop.xlane.xlu1 %1269 }
 0x2ed   : > { %2537 = vpow2.f32 %v1338_v28  ;;  %v1304_v36 = vsub.f32 %v2976_v51, %v1270_v39  ;;  %v1273_v41 = vpop.xlane.xlu0 %1272 }
 0x2ee   : > { %2539 = vpow2.f32 %v1340_v38  ;;  %v1305_v42 = vsub.f32 %v2981_v53, %v1273_v41 }
 0x2ef   : > { %v3036_v40 = vpop.eup %2527  ;;  %v1326_v43 = vmul.f32 1.442695, %v1304_v36 }
 0x2f0   : > { %v1328_v47 = vmul.f32 1.442695, %v1305_v42  ;;  %v1282_v48 = vpop.xlane.xlu1 %1281  ;;  %v1373_v46 = vsel %vm562_vm1, %v3036_v40, 0.0 }
 0x2f1   : > { %v2530_v49 = vpop.eup %2529  ;;  %2541 = vpow2.f32 %v1326_v43  ;;  %v1308_v50 = vsub.f32 %v2986_v58, %v1282_v48  ;;  %1374 = vadd.xlane.f32.xlu1 %v1373_v46  ;;  %v2433_v9 = vpop.permute.xlu0 %2432 }
 0x2f2   : > { %2543 = vpow2.f32 %v1328_v47  ;;  %v1370_v51 = vsel %vm562_vm1, %v2530_v49, 0.0  ;;  %v2434_v5 = vunpack.i.l.bf16 %v2433_v9  ;;  %v1398_v37 = vpack.c.bf16 %v3036_v40, %v2530_v49 }
 0x2f3   : > { %v2532_v52 = vpop.eup %2531  ;;  %v1334_v53 = vmul.f32 1.442695, %v1308_v50  ;;  %1371 = vadd.xlane.f32.xlu0 %v1370_v51  ;;  %v1349_v49 = vsel %vm562_vm1, %v2990_v60, 0.0 }
 0x2f4   : > { %v1294_v55 = vpop.xlane.xlu1 %1293  ;;  %v1352_v18 = vsel %vm562_vm1, %v2532_v52, 0.0  ;;  %v1395_v56 = vpack.c.bf16 %v2526_v14, %v2532_v52  ;;  %v2435_v14 = vunpack.i.h.bf16 %v2433_v9 }
 0x2f5   : > { %v2534_v57 = vpop.eup %2533  ;;  %2545 = vpow2.f32 %v1334_v53  ;;  %v1312_v58 = vsub.f32 %v2999_v2, %v1294_v55  ;;  %1353 = vadd.xlane.f32.xlu1 %v1352_v18 }
 0x2f6   : > { %2301 = vmatmul.mubr.msk.bf16.vlgmr.msra.gmra.mxu1 %vm562_vm1, %v1395_v56  ;;  %v1358_v62 = vsel %vm562_vm1, %v2534_v57, 0.0  ;;  %v1407_v25 = vpack.c.bf16 %v2435_v14, %v2434_v5 }
 0x2f7   : > { %v2536_v0 = vpop.eup %2535  ;;  %v1342_v1 = vmul.f32 1.442695, %v1312_v58  ;;  %2311 = vmatpush3.bf16.msra.mxu1 %v1405_v54  ;;  %1359 = vadd.xlane.f32.xlu0 %v1358_v62 }
 0x2f8   : > { %v1361_v3 = vsel %vm562_vm1, %v2536_v0, 0.0  ;;  %v1396_v6 = vpack.c.bf16 %v2536_v0, %v2534_v57  ;;  %2312 = vmatprep.mubr.msk.bf16.mxu1 %vm2649_vm0, %v2648_v4  ;;  %2322 = vmatprep.subr.bf16.mxu1 %v2648_v4  ;;  %v2438_v10 = vpop.permute.xlu1 %2437 }
 0x2f9   : > { %2547 = vpow2.f32 %v1342_v1  ;;  %1362 = vadd.xlane.f32.xlu1 %v1361_v3  ;;  %v2440_v15 = vunpack.i.h.bf16 %v2438_v10  ;;  %v2439_v17 = vunpack.i.l.bf16 %v2438_v10 }
 0x2fa   : > { %v2538_v2 = vpop.eup %2537  ;;  %2307 = vmatmul.mubr.msk.bf16.vlgmr.msra.gmra.mxu0 %vm562_vm1, %v1396_v6 }
 0x2fb   : > { %v2540_v11 = vpop.eup %2539  ;;  %2317 = vmatpush3.bf16.msra.mxu0 %v1406_v19  ;;  %v1382_v12 = vsel %vm562_vm1, %v2538_v2, 0.0  ;;  %2318 = vmatprep.mubr.msk.bf16.mxu0 %vm2649_vm0, %v2648_v4  ;;  %v1408_v16 = vpack.c.bf16 %v2440_v15, %v2439_v17 }
 0x2fc   : > { %1383 = vadd.xlane.f32.xlu0 %v1382_v12  ;;  %v1385_v13 = vsel %vm562_vm1, %v2540_v11, 0.0  ;;  %2328 = vmatprep.subr.bf16.mxu0 %v2648_v4  ;;  %v1400_v26 = vpack.c.bf16 %v2540_v11, %v2538_v2 }
 0x2fd   : > { %1386 = vadd.xlane.f32.xlu1 %v1385_v13 }
 0x2fe   : > { %v2542_v20 = vpop.eup %2541 }
 0x2ff   : > { %v2544_v21 = vpop.eup %2543  ;;  %v1364_v22 = vsel %vm562_vm1, %v2542_v20, 0.0 }
 0x300   : > { %1365 = vadd.xlane.f32.xlu0 %v1364_v22  ;;  %v1367_v23 = vsel %vm562_vm1, %v2544_v21, 0.0  ;;  %v1397_v24 = vpack.c.bf16 %v2544_v21, %v2542_v20 }
 0x301   : > { %1368 = vadd.xlane.f32.xlu1 %v1367_v23 }
 0x302   : > { %v2546_v27 = vpop.eup %2545  ;;  %2313 = vmatmul.mubr.msk.bf16.vlgmr.msra.gmra.mxu1 %vm562_vm1, %v1397_v24  ;;  %2319 = vmatmul.mubr.msk.bf16.vlgmr.msra.gmra.mxu0 %vm562_vm1, %v1398_v37 }
 0x303   : > { %2323 = vmatpush3.bf16.msra.mxu1 %v1407_v25  ;;  %2329 = vmatpush3.bf16.msra.mxu0 %v1408_v16  ;;  %v1376_v29 = vsel %vm562_vm1, %v2546_v27, 0.0 }
 0x304   : > { %1377 = vadd.xlane.f32.xlu0 %v1376_v29  ;;  %2330 = vmatprep.mubr.msk.bf16.mxu0 %vm2649_vm0, %v2648_v4 }
 0x305   : > { %2324 = vmatprep.mubr.msk.bf16.mxu1 %vm2649_vm0, %v2648_v4  ;;  %2334 = vmatprep.subr.bf16.mxu1 %v2648_v4 }
 0x306   : > { %v2548_v30 = vpop.eup %2547  ;;  %2340 = vmatprep.subr.bf16.mxu0 %v2648_v4 }
 0x307   : > { %v1388_v31 = vsel %vm562_vm1, %v2548_v30, 0.0 }
 0x308   : > { %1389 = vadd.xlane.f32.xlu0 %v1388_v31 }
 0x30a   : > { %2331 = vmatmul.mubr.msk.bf16.vlgmr.msra.gmra.mxu0 %vm562_vm1, %v1400_v26 }
 0x30b   : > { %2356 = vmatprep.mubr.msk.bf16.mxu0 %vm2649_vm0, %v2648_v4 }
 0x30c   : > { %1347 = vadd.xlane.f32.xlu0 %v1346_v32 }
 0x322   : > { %v1285_v33 = vpop.xlane.xlu0 %1284 }
 0x323   : > { %v1309_v34 = vsub.f32 %v3014_v7, %v1285_v33 }
 0x325   : > { %v1336_v35 = vmul.f32 1.442695, %v1309_v34 }
 0x326   : > { %v1297_v28 = vpop.xlane.xlu0 %1296 }
 0x327   : > { %2549 = vpow2.f32 %v1336_v35  ;;  %v1313_v38 = vsub.f32 %v3017_v8, %v1297_v28  ;;  %v3080_v39 = vpop.f32.mrf.mxu0  ;;  %v2514_v28 = vld [vmem:[%s3186_s3 + $0x30] sm:$0xff]  }
 0x329   : > { %v1344_v36 = vmul.f32 1.442695, %v1313_v38  ;;  %v2296_v41 = vpop.f32.mrf.mxu0 }
 0x32a   : > { %v2443_v40 = vpop.permute.xlu0 %2442 }
 0x32b   : > { %2551 = vpow2.f32 %v1344_v36  ;;  %v3082_v42 = vpop.f32.mrf.mxu0  ;;  %v2445_v43 = vunpack.i.h.bf16 %v2443_v40  ;;  %v2444_v44 = vunpack.i.l.bf16 %v2443_v40  ;;  %v2515_v40 = vld [vmem:[%s3186_s3 + $0x28] sm:$0xff]  }
 0x32d   : > { %v2297_v63 = vpop.f32.mrf.mxu0  ;;  %v1409_v48 = vpack.c.bf16 %v2445_v43, %v2444_v44 }
 0x334   : > { %v2550_v45 = vpop.eup %2549 }
 0x335   : > { %v1379_v47 = vsel %vm562_vm1, %v2550_v45, 0.0  ;;  %v1399_v7 = vpack.c.bf16 %v2550_v45, %v2546_v27 }
 0x336   : > { %1380 = vadd.xlane.f32.xlu1 %v1379_v47 }
 0x337   : > { %2325 = vmatmul.mubr.msk.bf16.vlgmr.msra.gmra.mxu1 %vm562_vm1, %v1399_v7 }
 0x338   : > { %v2552_v8 = vpop.eup %2551  ;;  %2335 = vmatpush3.bf16.msra.mxu1 %v1409_v48  ;;  %2336 = vmatprep.mubr.msk.bf16.mxu1 %vm2649_vm0, %v2648_v4 }
 0x339   : > { %v1391_v46 = vsel %vm562_vm1, %v2552_v8, 0.0  ;;  %v1401_v50 = vpack.c.bf16 %v2552_v8, %v2548_v30  ;;  %v2513_v30 = vld [vmem:[%s3186_s3 + $0x38] sm:$0xff]   ;;  %v2516_v8 = vld [vmem:[%s3186_s3 + $0x20] sm:$0xff]  }
 0x33a   : > { %1392 = vadd.xlane.f32.xlu1 %v1391_v46  ;;  %2341 = vmatpush3.bf16.msra.mxu0 %v2513_v30 }
 0x33b   : > { %2342 = vmatprep.subr.bf16.mxu0 %v2648_v4 }
 0x33e   : > { %1350 = vadd.xlane.f32.xlu1 %v1349_v49  ;;  %2343 = vmatpush3.bf16.msra.mxu0 %v2514_v28  ;;  %v2517_v49 = vld [vmem:[%s3186_s3 + $0x18] sm:$0xff]  }
 0x33f   : > { %2337 = vmatmul.mubr.msk.bf16.vlgmr.msra.gmra.mxu1 %vm562_vm1, %v1401_v50  ;;  %2344 = vmatprep.subr.bf16.mxu0 %v2648_v4 }
 0x342   : > { %2345 = vmatpush3.bf16.msra.mxu0 %v2515_v40 }
 0x343   : > { %2346 = vmatprep.subr.bf16.mxu0 %v2648_v4 }
 0x346   : > { %2347 = vmatpush3.bf16.msra.mxu0 %v2516_v8 }
 0x347   : > { %2348 = vmatprep.subr.bf16.mxu0 %v2648_v4 }
 0x34a   : > { %2349 = vmatpush3.bf16.msra.mxu0 %v2517_v49 }
 0x34b   : > { %2350 = vmatprep.subr.bf16.mxu0 %v2648_v4 }
 0x366   : > { %v1357_v52 = vpop.xlane.xlu0 %1356 }
 0x367   : > { %2553 = vrcp.f32 %v1357_v52 }
 0x374   : > { %v2554_v62 = vpop.eup %2553 }
 0x37a   : > { %v1375_v51 = vpop.xlane.xlu1 %1374 }
 0x37c   : > { %v1372_v53 = vpop.xlane.xlu0 %1371 }
 0x37e   : > { %v1354_v54 = vpop.xlane.xlu1 %1353 }
 0x37f   : > { %2555 = vrcp.f32 %v1354_v54  ;;  %v2518_v54 = vld [vmem:[%s3186_s3 + $0x10] sm:$0xff]  }
 0x380   : > { %v1360_v55 = vpop.xlane.xlu0 %1359  ;;  %2351 = vmatpush3.bf16.msra.mxu0 %v2518_v54 }
 0x381   : > { %2557 = vrcp.f32 %v1360_v55  ;;  %v2519_v55 = vld [vmem:[%s3186_s3 + $0x8] sm:$0xff]   ;;  %2352 = vmatprep.subr.bf16.mxu0 %v2648_v4 }
 0x382   : > { %v1363_v18 = vpop.xlane.xlu1 %1362 }
 0x383   : > { %2559 = vrcp.f32 %v1363_v18 }
 0x384   : > { %2561 = vrcp.f32 %v1375_v51  ;;  %2353 = vmatpush3.bf16.msra.mxu0 %v2519_v55 }
 0x385   : > { %v1384_v56 = vpop.xlane.xlu0 %1383  ;;  %2563 = vrcp.f32 %v1372_v53  ;;  %2354 = vmatprep.subr.bf16.mxu0 %v2648_v4 }
 0x386   : > { %v1387_v57 = vpop.xlane.xlu1 %1386 }
 0x389   : > { %v1366_v59 = vpop.xlane.xlu0 %1365 }
 0x38a   : > { %v1369_v61 = vpop.xlane.xlu1 %1368  ;;  %2565 = vrcp.f32 %v1366_v59 }
 0x38b   : > { %2567 = vrcp.f32 %v1369_v61 }
 0x38c   : > { %v2556_v0 = vpop.eup %2555  ;;  %2569 = vrcp.f32 %v1384_v56 }
 0x38d   : > { %2571 = vrcp.f32 %v1387_v57  ;;  %v1378_v50 = vpop.xlane.xlu0 %1377 }
 0x38e   : > { %v2558_v10 = vpop.eup %2557  ;;  %2573 = vrcp.f32 %v1378_v50 }
 0x390   : > { %v2560_v12 = vpop.eup %2559 }
 0x391   : > { %v2562_v22 = vpop.eup %2561  ;;  %v1390_v52 = vpop.xlane.xlu0 %1389 }
 0x392   : > { %v2564_v23 = vpop.eup %2563 }
 0x397   : > { %v2566_v25 = vpop.eup %2565 }
 0x398   : > { %v2568_v16 = vpop.eup %2567 }
 0x399   : > { %v2570_v43 = vpop.eup %2569 }
 0x39a   : > { %v2572_v44 = vpop.eup %2571 }
 0x39b   : > { %v2574_v57 = vpop.eup %2573 }
 0x3b6   : > { %v1491_v60 = vpop.f32.mrf.mxu1 }
 0x3b7   : > { %v1767_v6 = vmul.f32 %v2556_v0, %v1491_v60 }
 0x3b8   : > { %v2302_v58 = vpop.f32.mrf.mxu1 }
 0x3ba   : > { %v1494_v1 = vpop.f32.mrf.mxu1  ;;  %v1535_v3 = vpop.f32.mrf.mxu0 }
 0x3bb   : > { %v1769_v19 = vmul.f32 %v2554_v62, %v1494_v1  ;;  %v1771_v14 = vmul.f32 %v2558_v10, %v1535_v3  ;;  %v2520_v62 = vld [vmem:[%s3186_s3] sm:$0xff]  }
 0x3bc   : > { %v2303_v2 = vpop.f32.mrf.mxu1  ;;  %v2308_v9 = vpop.f32.mrf.mxu0  ;;  %2355 = vmatpush3.bf16.msra.mxu0 %v2520_v62 }
 0x3bd   : > { %v2446_v11 = vpack.i.bf16 %v1769_v19, %v1767_v6 }
 0x3be   : > { %v1538_v13 = vpop.f32.mrf.mxu0 }
 0x3bf   : > { %v1773_v5 = vmul.f32 %v2560_v12, %v1538_v13  ;;  %2447 = vrot.lane.b32.xlu0 %v2446_v11, %s2655_s11  ;;  %v1381_v51 = vpop.xlane.xlu1 %1380  ;;  %v1348_v13 = vpop.xlane.xlu0 %1347 }
 0x3c0   : > { %v2309_v15 = vpop.f32.mrf.mxu0  ;;  %2575 = vrcp.f32 %v1381_v51 }
 0x3c1   : > { %v2451_v17 = vpack.i.bf16 %v1773_v5, %v1771_v14  ;;  %2577 = vrcp.f32 %v1390_v52 }
 0x3c2   : > { %v1579_v20 = vpop.f32.mrf.mxu1  ;;  %v1623_v21 = vpop.f32.mrf.mxu0 }
 0x3c3   : > { %2452 = vrot.lane.b32.xlu1 %v2451_v17, %s2656_s12  ;;  %v1775_v31 = vmul.f32 %v2566_v25, %v1579_v20  ;;  %v1779_v26 = vmul.f32 %v2564_v23, %v1623_v21  ;;  %v1393_v53 = vpop.xlane.xlu1 %1392 }
 0x3c4   : > { %v2314_v24 = vpop.f32.mrf.mxu1  ;;  %v2320_v37 = vpop.f32.mrf.mxu0  ;;  %2579 = vrcp.f32 %v1393_v53 }
 0x3c5   : > { %2581 = vrcp.f32 %v1348_v13 }
 0x3c6   : > { %v1582_v27 = vpop.f32.mrf.mxu1  ;;  %v1626_v29 = vpop.f32.mrf.mxu0 }
 0x3c7   : > { %v1777_v32 = vmul.f32 %v2568_v16, %v1582_v27  ;;  %v1781_v33 = vmul.f32 %v2562_v22, %v1626_v29  ;;  %v1351_v14 = vpop.xlane.xlu1 %1350 }
 0x3c8   : > { %v2315_v34 = vpop.f32.mrf.mxu1  ;;  %v2321_v35 = vpop.f32.mrf.mxu0  ;;  %2583 = vrcp.f32 %v1351_v14 }
 0x3c9   : > { %v2456_v38 = vpack.i.bf16 %v1777_v32, %v1775_v31  ;;  %v2461_v36 = vpack.i.bf16 %v1781_v33, %v1779_v26 }
 0x3ca   : > { %v1711_v41 = vpop.f32.mrf.mxu0 }
 0x3cb   : > { %2462 = vrot.lane.b32.xlu0 %v2461_v36, %s2654_s10  ;;  %2457 = vrot.lane.b32.xlu1 %v2456_v38, %s2653_s9  ;;  %v1787_v47 = vmul.f32 %v2570_v43, %v1711_v41  ;;  %s2589_s10 = sshll.u32 %s2657_s19, 4  ;;  %s2590_s10 = int_to_ptr.vmem [resolvable:$false] %s2589_s10 }
 0x3cc   : > { %v2332_v63 = vpop.f32.mrf.mxu0  ;;  %s2591_s12 = scalar_lea.vmem %s2590_s10, 512 }
 0x3cd   : > { %v2576_v59 = vpop.eup %2575 }
 0x3ce   : > { %v1714_v45 = vpop.f32.mrf.mxu0  ;;  %v2578_v19 = vpop.eup %2577 }
 0x3cf   : > { %v1789_v7 = vmul.f32 %v2572_v44, %v1714_v45 }
 0x3d0   : > { %v2333_v48 = vpop.f32.mrf.mxu0 }
 0x3d1   : > { %v2471_v46 = vpack.i.bf16 %v1789_v7, %v1787_v47  ;;  %v2580_v2 = vpop.eup %2579 }
 0x3d2   : > { %v2582_v17 = vpop.eup %2581 }
 0x3d3   : > { %2472 = vrot.lane.b32.xlu0 %v2471_v46, %s2650_s6  ;;  %v1763_v24 = vmul.f32 %v2582_v17, %v3080_v39 }
 0x3d5   : > { %v2584_v20 = vpop.eup %2583 }
 0x3d6   : > { %v1765_v16 = vmul.f32 %v2584_v20, %v3082_v42 }
 0x3f7   : > { %v1667_v18 = vpop.f32.mrf.mxu1 }
 0x3f8   : > { %v1783_v60 = vmul.f32 %v2574_v57, %v1667_v18 }
 0x3f9   : > { %v2326_v56 = vpop.f32.mrf.mxu1 }
 0x3fb   : > { %v1670_v61 = vpop.f32.mrf.mxu1 }
 0x3fc   : > { %v1785_v58 = vmul.f32 %v2576_v59, %v1670_v61 }
 0x3fd   : > { %v2327_v0 = vpop.f32.mrf.mxu1 }
 0x3fe   : > { %v2466_v1 = vpack.i.bf16 %v1785_v58, %v1783_v60 }
 0x3ff   : > { %v1755_v3 = vpop.f32.mrf.mxu1 }
 0x400   : > { %2467 = vrot.lane.b32.xlu1 %v2466_v1, %s2652_s8  ;;  %v1791_v10 = vmul.f32 %v2578_v19, %v1755_v3 }
 0x401   : > { %v2338_v6 = vpop.f32.mrf.mxu1 }
 0x403   : > { %v1758_v9 = vpop.f32.mrf.mxu1 }
 0x404   : > { %v1793_v11 = vmul.f32 %v2580_v2, %v1758_v9 }
 0x405   : > { %v2339_v12 = vpop.f32.mrf.mxu1 }
 0x406   : > { %v2476_v4 = vpack.i.bf16 %v1793_v11, %v1791_v10 }
 0x408   : > { %2477 = vrot.lane.b32.xlu1 %v2476_v4, %s2651_s7  ;;  %s199_s7 = sand.u32 1, %s2637_s16  }
 0x409   : > { %s2067_s8 = sshll.u32 %s199_s7, 4  ;;  %s3143_s11 = scalar_lea.sflag [#allocation3], %s199_s7 }
 0x40a   : > { %s201_s23 = scalar_lea.vmem [#allocation2], %s2067_s8 }
 0x40b   : > { %s1992_s27 = sshll.u32 %s201_s23, 4  ;;  %s3136_s27 = int_to_ptr.vmem [resolvable:$true] %s1992_s27 }
 0x40c   : > { %s2585_s9 = scalar_lea.vmem %s3136_s27, 256  ;;  %p2592_p0 = scmp.lt.s32.totalorder %s3136_s27, %s2590_s10 }
 0x40d   : > { %p2586_p11 = scmp.ne.s32.totalorder %s3136_s27, %s2585_s9  ;;  %p2593_p1 = scmp.lt.s32.totalorder %s2591_s12, %s2585_s9 }
 0x40f   : > { %p2587_p12 = pnand %p2586_p11, %p2723_p5  ;;  %p2594_p2 = por %p2593_p1, %p2592_p0 }
 0x411   : > { %p2588_p13 = pneg %p2587_p12 }
 0x413   : > { %p2595_p3 = pnand %p2594_p2, %p2588_p13 }
 0x431   : > { %v2448_v15 = vpop.permute.xlu0 %2447 }
 0x432   : > { %v2450_v22 = vunpack.i.h.bf16 %v2448_v15  ;;  %v2449_v23 = vunpack.i.l.bf16 %v2448_v15 }
 0x434   : > { %v1850_v26 = vsel %vm562_vm1, %v1763_v24, %v2449_v23  ;;  %v1851_v32 = vsel %vm562_vm1, %v1765_v16, %v2450_v22 }
 0x435   : > { %v2453_v5 = vpop.permute.xlu1 %2452 }
 0x436   : > { %v2455_v37 = vunpack.i.h.bf16 %v2453_v5  ;;  %v2454_v25 = vunpack.i.l.bf16 %v2453_v5 }
 0x438   : > { %v1854_v33 = vsel %vm1852_vm2, %v1851_v32, %v2455_v37  ;;  %v1853_v34 = vsel %vm1852_vm2, %v1850_v26, %v2454_v25 }
 0x43d   : > { %v2458_v21 = vpop.permute.xlu1 %2457  ;;  %v2463_v27 = vpop.permute.xlu0 %2462 }
 0x43e   : > { %v2460_v29 = vunpack.i.h.bf16 %v2458_v21  ;;  %v2459_v30 = vunpack.i.l.bf16 %v2458_v21  ;;  %v2465_v35 = vunpack.i.h.bf16 %v2463_v27  ;;  %v2464_v28 = vunpack.i.l.bf16 %v2463_v27 }
 0x440   : > { %v1856_v39 = vsel %vm1855_vm3, %v1853_v34, %v2459_v30  ;;  %v1857_v38 = vsel %vm1855_vm3, %v1854_v33, %v2460_v29 }
 0x441   : > { %v1859_v63 = vsel %vm1858_vm4, %v1856_v39, %v2464_v28  ;;  %v1860_v40 = vsel %vm1858_vm4, %v1857_v38, %v2465_v35 }
 0x445   : > { %v2473_v42 = vpop.permute.xlu0 %2472 }
 0x446   : > { %v2475_v45 = vunpack.i.h.bf16 %v2473_v42  ;;  %v2474_v47 = vunpack.i.l.bf16 %v2473_v42 }
 0x472   : > { %v2468_v31 = vpop.permute.xlu1 %2467 }
 0x473   : > { %v2470_v36 = vunpack.i.h.bf16 %v2468_v31  ;;  %v2469_v41 = vunpack.i.l.bf16 %v2468_v31 }
 0x475   : > { %v1862_v43 = vsel %vm1861_vm5, %v1859_v63, %v2469_v41  ;;  %v1863_v44 = vsel %vm1861_vm5, %v1860_v40, %v2470_v36 }
 0x476   : > { %v1865_v46 = vsel %vm1864_vm6, %v1862_v43, %v2474_v47  ;;  %v1866_v49 = vsel %vm1864_vm6, %v1863_v44, %v2475_v45 }
 0x47a   : > { %v2478_v7 = vpop.permute.xlu1 %2477 }
 0x47b   : > { %v2480_v48 = vunpack.i.h.bf16 %v2478_v7  ;;  %v2479_v8 = vunpack.i.l.bf16 %v2478_v7 }
 0x47d   : > { %v1868_v50 = vsel %vm1867_vm7, %v1865_v46, %v2479_v8  ;;  %v1869_v51 = vsel %vm1867_vm7, %v1866_v49, %v2480_v48 }
 0x47e   : > { %v1870_v52 = vpack.c.bf16 %v1869_v51, %v1868_v50 }
 0x480   : > { %2357 = vmatmul.mubr.bf16.vlgmr.msra.gmra.mxu0 %v1870_v52 }
 0x540   : > { %v1969_v53 = vpop.f32.mrf.mxu0 }
 0x541   : > { %1976 = vst [vmem:[%s201_s23] sm:$0xff] %v1969_v53 }
 0x542   : > { %v2358_v54 = vpop.f32.mrf.mxu0 }
 0x544   : > { %v1972_v55 = vpop.f32.mrf.mxu0 }
 0x545   : > { %1977 = vst [vmem:[%s201_s23 + $0x8] sm:$0xff] %v1972_v55 }
 0x546   : > { %v2359_v18 = vpop.f32.mrf.mxu0 }
 0x547   : > { %2598 = shalt.err (!%p2595_p3)
}
 0x548   : > { %s2599_s13 = scalar_lea.hbm %s3141_s30, 256  ;;  %s2603_s22 = scalar_lea.hbm %s3187_s4, 512 }
 0x549   : > { %p2600_p4 = scmp.ne.s32.totalorder %s3141_s30, %s2599_s13  ;;  %p2604_p9 = scmp.lt.s32.totalorder %s3141_s30, %s3187_s4 }
 0x54a   : > { %p2605_p10 = scmp.lt.s32.totalorder %s2603_s22, %s2599_s13 }
 0x54b   : > { %p2601_p7 = pnand %p2600_p4, %p2723_p5 }
 0x54c   : > { %p2606_p11 = por %p2605_p10, %p2604_p9 }
 0x54d   : > { %p2602_p8 = pneg %p2601_p7 }
 0x54f   : > { %p2607_p12 = pnand %p2606_p11, %p2602_p8 }
 0x551   : > { %2610 = shalt.err (!%p2607_p12)
}
 0x552   : > { %s2658_s8 = smov 128   ;;  %s2659_s23 = smov 8  }
 0x553   : > { %2360 = dma.vmem_to_hbm [thread:$0]  (%p2723_p5), %s3136_s27, 256, %s3141_s30, %s3143_s11, %s2658_s8, %s2658_s8, %s2659_s23  }
 0x554 PF: > { %p2366_p13 = scmp.ge.s32.totalorder %s2645_s18, 2  ;;  %s2007_s5 = sand.u32 1, %s2633_s15  }
 0x555   : > { %s2008_s28 = scalar_lea.sflag [#allocation3], %s2007_s5 }
 0x556   : > { %p2363_p0 = pnand %p2366_p13, %p2727_p6 }
 0x558   : > { %p2364_p1 = pneg %p2363_p0 }
 0x55a   : > { %2628 = dma.done.wait (%p2364_p1), %s2008_s28, 256  }
 0x55b   : > { %2630 = vsyncadd (%p2364_p1), %s2008_s28, 4294967040  ;;  %p14_p2 = scmp.ge.s32.totalorder %s2710_s21, 4   ;;  %s3190_s15 = smov %s2637_s16 }
 0x55c   : > { %s3191_s16 = smov %s2641_s17  ;;  %s3192_s17 = smov %s2721_s24 }
 0x55d   : > { %s3193_s18 = smov %s2710_s21  ;;  %16 = sbr.rel (!%p14_p2) target bundleno = 3 (0x3), region = 74 }
 0x562   :  { %2013 = vsyncpa [#allocation3], 1 }
 0x563   :  { %2015 = vsyncpa [#allocation3 + $0x1], 1 }

</bundles_post_ra>
